<compile_context>
chip_gen: v7x
topology: tpu7x:2x2x1
jax: 0.10.0
libtpu: 0.0.40
codegen_flags: <defaults>
</compile_context>

<pallas_src>
import jax
import jax.numpy as jnp
from jax.experimental import pallas as pl
from jax.experimental.pallas import tpu as pltpu

_SUBLANE = 8
_LANE = 128
_BATCH_TILE = 256           # Bt for the batched Pallas template
_SMALL_B_THRESHOLD = 256    # below this, XLA fusion beats the Pallas launch


def _round_up(x, m):
    return (x + m - 1) // m * m


# ---------------------------------------------------------------------------
# forward(): returns the constant 1.  No Pallas launch.
# ---------------------------------------------------------------------------
def model_forward():
    """Equivalent of Model.forward(): returns 1."""
    return 1


# ---------------------------------------------------------------------------
# fc = Linear(768, 32):  y = x @ W + b
# ---------------------------------------------------------------------------
def init_fc_params(weight, bias):
    """One-time (static) parameter prep.

    weight: (768, 32) f32 (already transposed vs torch's (out,in)),
    bias: (32,) f32.
    Returns both the raw f32/bf16 params (XLA fast path) and the padded,
    lane-dense bf16/f32 tiles the Pallas kernel consumes.
    """
    K, N = weight.shape
    assert bias.shape == (N,)
    Np = _round_up(N, _LANE)  # 32 -> 128 lanes; do NOT pad further (DMA-bound)

    w_bf16 = weight.astype(jnp.bfloat16)
    b_f32 = bias.astype(jnp.float32)
    w_pad = jnp.pad(w_bf16, ((0, 0), (0, Np - N)))            # (K, Np) bf16
    b_pad = jnp.pad(b_f32, (0, Np - N)).reshape(1, Np)         # (1, Np) f32
    return {"w": w_bf16, "b": b_f32, "w_pad": w_pad, "b_pad": b_pad,
            "n": N, "k": K, "np": Np}


def _linear_kernel(x_ref, w_ref, b_ref, o_ref):
    # x: (Bt, K) bf16, w: (K, Np) bf16, b: (1, Np) f32, o: (Bt, Np) f32.
    # Single MXU matmul with f32 accumulation; bias broadcast over sublanes
    # costs nothing on the VPU (huge slack next to the MXU op).
    acc = jnp.dot(x_ref[...], w_ref[...], preferred_element_type=jnp.float32)
    o_ref[...] = acc + b_ref[...]


def _fc_pallas(x, params):
    """Batched Pallas template: grid over the batch dimension."""
    B, K = x.shape
    Np = params["np"]
    N = params["n"]

    Bt = min(_BATCH_TILE, _round_up(B, _SUBLANE))
    Bp = _round_up(B, Bt)
    # Single Pad HLO for the only per-call tensor.
    x_p = jnp.pad(x.astype(jnp.bfloat16), ((0, Bp - B), (0, 0)))

    out_p = pl.pallas_call(
        _linear_kernel,
        out_shape=jax.ShapeDtypeStruct((Bp, Np), jnp.float32),
        grid_spec=pltpu.PrefetchScalarGridSpec(
            num_scalar_prefetch=0,
            grid=(Bp // Bt,),
            in_specs=[
                pl.BlockSpec((Bt, K), lambda i: (i, 0)),   # x: streamed
                pl.BlockSpec((K, Np), lambda i: (0, 0)),   # weight: resident
                pl.BlockSpec((1, Np), lambda i: (0, 0)),   # bias row: resident
            ],
            out_specs=pl.BlockSpec((Bt, Np), lambda i: (i, 0)),
        ),
        compiler_params=pltpu.CompilerParams(
            dimension_semantics=("parallel",)),  # v7x: shard batch over 2 TCs
    )(x_p, params["w_pad"], params["b_pad"])

    return out_p[:B, :N]


def fc_forward(x, params):
    """x: (B, 768) f32 -> (B, 32) f32."""
    B, K = x.shape
    assert K == params["k"]
    if B < _SMALL_B_THRESHOLD:
        # Tiny shape (e.g. the module's B=2): the matmul is <0.1 us of MXU
        # time; one fused XLA op beats the Pallas launch + DMAs outright.
        return (jnp.dot(x.astype(jnp.bfloat16), params["w"],
                        preferred_element_type=jnp.float32)
                + params["b"])
    return _fc_pallas(x, params)


if __name__ == "__main__":
    # --- forward() semantics: returns 1 ---
    result = model_forward()
    assert result == 1, f"forward() returned {result}, expected 1"

    key = jax.random.PRNGKey(0)
    k_x, k_w, k_b, k_x2 = jax.random.split(key, 4)

    IN, OUT = 768, 32
    bound = 1.0 / jnp.sqrt(IN)  # torch.nn.Linear default init range
    w = jax.random.uniform(k_w, (IN, OUT), minval=-bound, maxval=bound,
                           dtype=jnp.float32)
    b = jax.random.uniform(k_b, (OUT,), minval=-bound, maxval=bound,
                           dtype=jnp.float32)
    params = init_fc_params(w, b)  # static prep, hoisted out of the call

    # --- module's actual fc shape (B=2): XLA fast path ---
    x_small = jax.random.normal(k_x, (2, IN), dtype=jnp.float32)
    y_small = jax.block_until_ready(fc_forward(x_small, params))
    ref_small = x_small @ w + b
    assert y_small.shape == (2, OUT)
    assert jnp.allclose(y_small, ref_small, atol=2e-2, rtol=2e-2), \
        "fc (small-B XLA path) mismatch"

    # --- batched template: Pallas MXU kernel with batch grid ---
    x_big = jax.random.normal(k_x2, (512, IN), dtype=jnp.float32)
    y_big = jax.block_until_ready(fc_forward(x_big, params))
    ref_big = x_big @ w + b
    assert y_big.shape == (512, OUT)
    assert jnp.allclose(y_big, ref_big, atol=2e-2, rtol=2e-2), \
        "fc (Pallas batched path) mismatch"

    print("KERNEL_OK")
</pallas_src>

<mosaic_0001>
module attributes {stable_mosaic.version = 11 : i64} {
  func.func @_linear_kernel(%arg0: i32, %arg1: memref<256x768xbf16, #tpu.memory_space<vmem>>, %arg2: memref<768x128xbf16, #tpu.memory_space<vmem>>, %arg3: memref<1x128xf32, #tpu.memory_space<vmem>>, %arg4: memref<256x128xf32, #tpu.memory_space<vmem>>) attributes {dimension_semantics = [#tpu.dimension_semantics<parallel>], iteration_bounds = array<i64: 2>, scalar_prefetch = 0 : i64, scratch_operands = 0 : i64, tpu.core_type = #tpu.core_type<tc>, window_params = [{transform_indices = @transform_0, window_bounds = array<i64: 256, 768>}, {pipeline_mode = #tpu.pipeline_mode<synchronous>, transform_indices = @transform_1, window_bounds = array<i64: 768, 128>}, {pipeline_mode = #tpu.pipeline_mode<synchronous>, transform_indices = @transform_2, window_bounds = array<i64: 1, 128>}, {transform_indices = @transform_3, window_bounds = array<i64: 256, 128>}]} {
    %c0 = arith.constant 0 : index
    %c0_0 = arith.constant 0 : index
    %0 = vector.load %arg1[%c0, %c0_0] : memref<256x768xbf16, #tpu.memory_space<vmem>>, vector<256x768xbf16>
    %c0_1 = arith.constant 0 : index
    %c0_2 = arith.constant 0 : index
    %1 = vector.load %arg2[%c0_1, %c0_2] : memref<768x128xbf16, #tpu.memory_space<vmem>>, vector<768x128xbf16>
    %cst = arith.constant dense<0.000000e+00> : vector<256x128xf32>
    %2 = tpu.matmul %0, %1, %cst {dimension_numbers = #tpu.dot_dimension_numbers<[1], [0], [0], [1], [0, 0, 1, 1], [], []>} : vector<256x768xbf16>, vector<768x128xbf16>, vector<256x128xf32> -> vector<256x128xf32>
    %c0_3 = arith.constant 0 : index
    %c0_4 = arith.constant 0 : index
    %3 = vector.load %arg3[%c0_3, %c0_4] : memref<1x128xf32, #tpu.memory_space<vmem>>, vector<1x128xf32>
    %4 = vector.broadcast %3 : vector<1x128xf32> to vector<256x128xf32>
    %5 = arith.addf %2, %4 : vector<256x128xf32>
    %c0_5 = arith.constant 0 : index
    %c0_6 = arith.constant 0 : index
    %6 = vector.load %arg4[%c0_5, %c0_6] : memref<256x128xf32, #tpu.memory_space<vmem>>, vector<256x128xf32>
    tpu.vector_store %arg4[%c0_5, %c0_6], %5 {strides = array<i32>} : memref<256x128xf32, #tpu.memory_space<vmem>>, vector<256x128xf32>,
    return
  }
  func.func @transform_0(%arg0: i32) -> (i32, i32) {
    %c0_i32 = arith.constant 0 : i32
    %c0_i32_0 = arith.constant 0 : i32
    return %arg0, %c0_i32 : i32, i32
  }
  func.func @transform_1(%arg0: i32) -> (i32, i32) {
    %c0_i32 = arith.constant 0 : i32
    %c0_i32_0 = arith.constant 0 : i32
    %c0_i32_1 = arith.constant 0 : i32
    return %c0_i32, %c0_i32_0 : i32, i32
  }
  func.func @transform_2(%arg0: i32) -> (i32, i32) {
    %c0_i32 = arith.constant 0 : i32
    %c0_i32_0 = arith.constant 0 : i32
    %c0_i32_1 = arith.constant 0 : i32
    return %c0_i32, %c0_i32_0 : i32, i32
  }
  func.func @transform_3(%arg0: i32) -> (i32, i32) {
    %c0_i32 = arith.constant 0 : i32
    %c0_i32_0 = arith.constant 0 : i32
    return %arg0, %c0_i32 : i32, i32
  }
}

</mosaic_0001>

<bundles_post_ra>
// kernel: tpu_custom_call.1
= control target key start
LH: loop header
LB: loop body
LE: loop exit
PB: predicated region body
PF: predicated region fallthrough
CT: control target
= control target key end

     0   :  { %8 = vsyncpa [#allocation3], 0  ;;  %s3185_s0 = inlined_call_operand.hbm [shape: bf16[512,768], index: 0, kind: input, shape index: {}]   ;;  %s3186_s1 = inlined_call_operand.hbm [shape: bf16[768,128], index: 1, kind: input, shape index: {}]   ;;  %s3187_s2 = inlined_call_operand.vmem [shape: f32[1,128], index: 2, kind: input, shape index: {}]   ;;  %s3188_s3 = inlined_call_operand.hbm [shape: f32[512,128], index: 3, kind: output, shape index: {}]  }
   0x1   :  { %10 = vsyncpa [#allocation3 + $0x1], 0 }
   0x2   :  { %11 = vsyncpa [#allocation6], 0 }
   0x3   :  { %12 = vsyncpa [#allocation4], 0 }
   0x4   :  { %14 = vsyncpa [#allocation4 + $0x1], 0  ;;  %s2717_s12 = smov 0   ;;  %s2719_s13 = smov 0  }
   0x5   :  { %s2721_s14 = smov 0   ;;  %s2723_s15 = smov 0  }
   0x6 LB: > { %s2738_s16 = sadd.s32 4294967295, %s2686_s15   ;;  %s1787_s17 = sadd.s32 4294967294, %s2686_s15   ;;  %s2686_s15 = sphi %s2723_s15, %s3208_s15   ;;  %s2682_s14 = sphi %s2721_s14, %s3207_s14   ;;  %s2678_s13 = sphi %s2719_s13, %s3206_s13   ;;  %s2674_s12 = sphi %s2717_s12, %s3205_s12  }
   0x7   : > { %p40_p0 = scmp.ne.s32.totalorder %s2678_s13, %s2674_s12  ;;  %p3189_p1 = scmp.eq.s32.totalorder %s2738_s16, 0 }
   0x8   : > { %p112_p3 = scmp.eq.s32.totalorder %s1787_s17, 1  ;;  %p1788_p5 = scmp.ge.s32.totalorder %s2686_s15, 1 }
   0x9   : > { %p2747_p4 = por %p3189_p1, %p40_p0  ;;  %p119_p7 = scmp.lt.s32.totalorder %s2686_s15, 3 }
   0xa   : > { %p2752_p6 = por %p112_p3, %p40_p0  ;;  %s2688_s21 = smov [#allocation5]  }
   0xb   : > { %s3192_s18 = scalar_select %p2747_p4, 1, 0 }
   0xc   : > { %s3193_s19 = scalar_select %p2752_p6, 1, 0 }
   0xd   : > { %p2757_p8 = pnand %p1788_p5, %p119_p7  ;;  %s131_s22 = sshll.u32 %s2688_s21, 4  ;;  %s2761_s22 = int_to_ptr.vmem [resolvable:$true] %s131_s22 }
   0xe   : > { %s2773_s24 = sadd.s32 1, %s2686_s15   ;;  %s27_s25 = sadd.s32 1, %s2682_s14 }
   0xf   : > { %s3194_s20 = scalar_select %p2757_p8, 1, 0 }
  0x10   : > { %p2311_p9 = pneg %p2757_p8  ;;  %s24_s26 = ssub.s32 %s2686_s15, %s2773_s24 }
  0x11   : > { %s2558_s29 = scalar_lea.hbm %s3186_s1, 6144 }
  0x12   : > { %p2768_p11 = pnand %p2311_p9, %p3189_p1  ;;  %p2559_p12 = scmp.ne.s32.totalorder %s3186_s1, %s2558_s29 }
  0x13   : > { %p2565_p5 = scmp.lt.u32.totalorder %s2558_s29, %s3186_s1 }
  0x14   : > { %p2560_p13 = pneg %p2768_p11 }
  0x16   : > { %p2561_p0 = pnand %p2560_p13, %p2559_p12 }
  0x18   : > { %p2562_p3 = pneg %p2561_p0 }
  0x1a   : > { %p2567_p7 = pnand %p2565_p5, %p2562_p3 }
  0x1c   : > { %2570 = shalt.err (!%p2567_p7)
}
  0x1d   : > { %s2571_s7 = scalar_lea.vmem %s2761_s22, 6144  ;;  %p2579_p2 = scmp.lt.s32.totalorder %s2761_s22, %s2761_s22 }
  0x1e   : > { %p2572_p9 = scmp.ne.s32.totalorder %s2761_s22, %s2571_s7  ;;  %p2580_p6 = scmp.lt.s32.totalorder %s2571_s7, %s2571_s7 }
  0x20   : > { %p2574_p10 = pnand %p2572_p9, %p2560_p13  ;;  %p2581_p4 = por %p2580_p6, %p2579_p2 }
  0x22   : > { %p2575_p1 = pneg %p2574_p10 }
  0x24   : > { %p2582_p8 = pnand %p2581_p4, %p2575_p1 }
  0x26   : > { %2585 = shalt.err (!%p2582_p8)
}
  0x27   : > { %s2689_s8 = smov 64   ;;  %s2690_s9 = smov 4  }
  0x28   : > { %2314 = dma.hbm_to_vmem [thread:$0]  (!%p2768_p11), %s3186_s1, 6144, %s2761_s22, [#allocation6], %s2689_s8, %s2689_s8, %s2690_s9  }
  0x29   : > { %p25_p2 = scmp.eq.s32.totalorder %s24_s26, 0  ;;  %p34_p1 = scmp.ne.s32.totalorder %s2682_s14, %s2678_s13 }
  0x2a   : > { %p35_p4 = scmp.eq.s32.totalorder %s2686_s15, 0  ;;  %p2324_p6 = scmp.lt.s32.totalorder %s2686_s15, 2 }
  0x2b   : > { %s2804_s17 = scalar_select %p25_p2, %s2682_s14, %s27_s25  }
  0x2c   : > { %p36_p8 = por %p35_p4, %p34_p1  ;;  %p3196_p10 = scmp.eq.s32.totalorder %s2738_s16, 1 }
  0x2d   : > { %s148_s27 = sand.u32 1, %s2682_s14   ;;  %s2301_s28 = smul.u32 12288, %s2686_s15 }
  0x2e   : > { %p2808_p12 = por %p3196_p10, %p34_p1  ;;  %s2300_s29 = smul.u32 768, %s148_s27 }
  0x2f   : > { %s2817_s4 = scalar_lea.hbm %s3185_s0, %s2301_s28  ;;  %p2819_p11 = pnand %p2324_p6, %p36_p8 }
  0x30   : > { %s152_s25 = scalar_lea.vmem [#allocation2], %s2300_s29  ;;  %s2825_s5 = scalar_lea.sflag [#allocation3], %s148_s27 }
  0x31   : > { %s160_s26 = sshll.u32 %s152_s25, 4  ;;  %s2586_s6 = scalar_lea.hbm %s2817_s4, 12288  ;;  %s2823_s26 = int_to_ptr.vmem [resolvable:$true] %s160_s26 }
  0x32   : > { %p2587_p13 = scmp.ne.s32.totalorder %s2817_s4, %s2586_s6  ;;  %p2588_p0 = pneg %p2819_p11 }
  0x33   : > { %s2591_s9 = scalar_lea.hbm %s3185_s0, 24576  ;;  %p2592_p7 = scmp.lt.u32.totalorder %s2817_s4, %s3185_s0 }
  0x34   : > { %p2589_p3 = pnand %p2588_p0, %p2587_p13  ;;  %p2593_p9 = scmp.lt.u32.totalorder %s2591_s9, %s2586_s6 }
  0x35   : > { %p2595_p1 = scmp.lt.u32.totalorder %s2586_s6, %s2817_s4 }
  0x36   : > { %p2590_p5 = pneg %p2589_p3  ;;  %p2594_p2 = por %p2593_p9, %p2592_p7 }
  0x38   : > { %p2596_p4 = por %p2595_p1, %p2594_p2 }
  0x3a   : > { %p2597_p6 = pnand %p2596_p4, %p2590_p5 }
  0x3c   : > { %2600 = shalt.err (!%p2597_p6)
}
  0x3d   : > { %s2601_s27 = scalar_lea.vmem %s2823_s26, 12288  ;;  %s2691_s28 = smov [#allocation2]  }
  0x3e   : > { %p2602_p8 = scmp.ne.s32.totalorder %s2823_s26, %s2601_s27  ;;  %s2606_s29 = sshll.u32 %s2691_s28, 4  ;;  %s2607_s29 = int_to_ptr.vmem [resolvable:$false] %s2606_s29 }
  0x3f   : > { %s2608_s23 = scalar_lea.vmem %s2607_s29, 24576  ;;  %p2609_p3 = scmp.lt.s32.totalorder %s2823_s26, %s2607_s29 }
  0x40   : > { %p2604_p10 = pnand %p2602_p8, %p2588_p0  ;;  %p2610_p7 = scmp.lt.s32.totalorder %s2608_s23, %s2601_s27 }
  0x42   : > { %p2605_p13 = pneg %p2604_p10  ;;  %p2611_p9 = por %p2610_p7, %p2609_p3 }
  0x44   : > { %p2612_p2 = pnand %p2611_p9, %p2605_p13 }
  0x46   : > { %2615 = shalt.err (!%p2612_p2)
}
  0x47   : > { %s2692_s30 = smov 384   ;;  %s2693_s25 = smov 24  }
  0x48   : > { %2318 = dma.hbm_to_vmem [thread:$0]  (!%p2819_p11), %s2817_s4, 12288, %s2823_s26, %s2825_s5, %s2692_s30, %s2692_s30, %s2693_s25  }
  0x49   : > { %p3199_p0 = scmp.ne.s32.totalorder %s3194_s20, 0 }
  0x4a   : > { %s2856_s6 = sand.u32 (!%p3199_p0), 1, %s2678_s13   ;;  %p3200_p5 = scmp.ne.s32.totalorder (!%p3199_p0), %s3192_s18, 0 }
  0x4b   : > { %172 = sbr.rel (%p3199_p0) target bundleno = 539 (0x21b), region = 32  ;;  %s175_s8 = scalar_lea.sflag (!%p3199_p0), [#allocation3], %s2856_s6 }
  0x4c   : > { %s2302_s7 = smul.u32 (!%p3199_p0), 768, %s2856_s6 }
  0x4e   : > { %s2860_s9 = scalar_lea.vmem (!%p3199_p0), [#allocation2], %s2302_s7 }
  0x52   : > { %2661 = dma.done.wait (%p3200_p5), %s175_s8, 12288  }
  0x53   : > { %2663 = vsyncadd (%p3200_p5), %s175_s8, 4294955008  ;;  %p3201_p11 = scmp.eq.s32.totalorder %s2738_s16, 0 }
  0x55   : > { %2665 = dma.done.wait (%p3201_p11), [#allocation6], 6144   ;;  %p3202_p1 = pmov %p3201_p11 }
  0x56   : > { %v2366_v0 = vld [vmem:[#allocation5 + $0x40] sm:$0xff]   ;;  %v2368_v2 = vld [vmem:[#allocation5 + $0x48] sm:$0xff]   ;;  %v2370_v4 = vld [vmem:[#allocation5 + $0x50] sm:$0xff]   ;;  %s1796_s4 = sshll.u32 %s2856_s6, 8  ;;  %s1947_s26 = sshll.u32 %s2738_s16, 12 }
  0x57   : > { %2667 = vsyncadd (%p3202_p1), [#allocation6], 4294961152  ;;  %v2367_v1 = vld [vmem:[#allocation5] sm:$0xff]   ;;  %1948 = vmatprep.subr.bf16.mxu0 %v2366_v0  ;;  %2284 = vmatprep.subr.bf16.mxu1 %v2366_v0  ;;  %v2369_v3 = vld [vmem:[#allocation5 + $0x8] sm:$0xff]   ;;  %s3056_s22 = scalar_lea.vmem [#allocation7], %s1796_s4  ;;  %s3137_s27 = scalar_lea.hbm %s3188_s3, %s1947_s26 }
  0x58   : > { %1949 = vmatpush3.bf16.msra.mxu0 %v2367_v1  ;;  %2292 = vmatpush3.bf16.msra.mxu1 %v2367_v1  ;;  %v2371_v5 = vld [vmem:[#allocation5 + $0x10] sm:$0xff]   ;;  %v2372_v6 = vld [vmem:[#allocation5 + $0x58] sm:$0xff]   ;;  %v2374_v8 = vld [vmem:[#allocation5 + $0x60] sm:$0xff]   ;;  %s1704_s5 = sshll.u32 %s3056_s22, 4  ;;  %s1691_s28 = scalar_lea.sflag [#allocation4], %s2856_s6  ;;  %s3139_s5 = int_to_ptr.vmem [resolvable:$true] %s1704_s5 }
  0x59   : > { %1950 = vmatprep.subr.bf16.mxu0 %v2368_v2  ;;  %2285 = vmatprep.subr.bf16.mxu1 %v2368_v2  ;;  %v2373_v7 = vld [vmem:[#allocation5 + $0x18] sm:$0xff]   ;;  %v2375_v9 = vld [vmem:[#allocation5 + $0x20] sm:$0xff]   ;;  %v2376_v10 = vld [vmem:[#allocation5 + $0x68] sm:$0xff]   ;;  %s2616_s29 = scalar_lea.vmem %s3139_s5, 4096  ;;  %s2694_s16 = smov [#allocation7]  }
  0x5a   : > { %v2384_v11 = vld [vmem:[%s2860_s9 + $0x4] ss:$24 sps:$4 sm:$0xff]   ;;  %v2377_v13 = vld [vmem:[#allocation5 + $0x28] sm:$0xff]   ;;  %v2378_v14 = vld [vmem:[#allocation5 + $0x70] sm:$0xff]   ;;  %p2617_p4 = scmp.ne.s32.totalorder %s3139_s5, %s2616_s29  ;;  %s2620_s23 = sshll.u32 %s2694_s16, 4  ;;  %s2621_s23 = int_to_ptr.vmem [resolvable:$false] %s2620_s23 }
  0x5b   : > { %v2387_v12 = vld [vmem:[%s2860_s9 + $0x184] ss:$24 sps:$4 sm:$0xff]   ;;  %1207 = vmatprep.mubr.bf16.mxu0 %v2384_v11  ;;  %v2379_v15 = vld [vmem:[#allocation5 + $0x30] sm:$0xff]   ;;  %v2382_v19 = vld [vmem:[%s2860_s9] ss:$24 sps:$4 sm:$0xff]   ;;  %s2622_s30 = scalar_lea.vmem %s2621_s23, 8192  ;;  %p2623_p10 = scmp.lt.s32.totalorder %s3139_s5, %s2621_s23 }
  0x5c   : > { %1951 = vmatpush3.bf16.msra.mxu0 %v2369_v3  ;;  %2293 = vmatpush3.bf16.msra.mxu1 %v2369_v3  ;;  %v2380_v16 = vld [vmem:[#allocation5 + $0x78] sm:$0xff]   ;;  %v2388_v18 = vld [vmem:[#allocation5 + $0xc0] sm:$0xff]   ;;  %v2392_v24 = vld [vmem:[%s2860_s9 + $0x34] ss:$24 sps:$4 sm:$0xff]   ;;  %p2618_p6 = pnand %p2617_p4, %p2808_p12  ;;  %p2624_p13 = scmp.lt.s32.totalorder %s2622_s30, %s2616_s29 }
  0x5d   : > { %1952 = vmatprep.subr.bf16.mxu0 %v2370_v4  ;;  %2286 = vmatprep.subr.bf16.mxu1 %v2370_v4  ;;  %v2381_v17 = vld [vmem:[#allocation5 + $0x38] sm:$0xff]   ;;  %v2390_v20 = vld [vmem:[#allocation5 + $0x140] sm:$0xff]   ;;  %v2394_v25 = vld [vmem:[%s2860_s9 + $0x1b4] ss:$24 sps:$4 sm:$0xff]  }
  0x5e   : > { %1271 = vmatprep.mubr.bf16.mxu1 %v2387_v12  ;;  %v2385_v21 = vld [vmem:[%s2860_s9 + $0x180] ss:$24 sps:$4 sm:$0xff]   ;;  %v2398_v26 = vld [vmem:[#allocation5 + $0xc8] sm:$0xff]   ;;  %v2408_v30 = vld [vmem:[#allocation5 + $0xd0] sm:$0xff]   ;;  %p2619_p8 = pneg %p2618_p6  ;;  %p2625_p3 = por %p2624_p13, %p2623_p10 }
  0x5f   : > { %v2389_v22 = vld [vmem:[#allocation5 + $0x80] sm:$0xff]   ;;  %v2399_v27 = vld [vmem:[#allocation5 + $0x88] sm:$0xff]   ;;  %v2410_v33 = vld [vmem:[#allocation5 + $0x150] sm:$0xff]  }
  0x60   : > { %1953 = vmatpush3.bf16.msra.mxu0 %v2371_v5  ;;  %2294 = vmatpush3.bf16.msra.mxu1 %v2371_v5  ;;  %v2391_v23 = vld [vmem:[#allocation5 + $0x100] sm:$0xff]   ;;  %v2400_v28 = vld [vmem:[#allocation5 + $0x148] sm:$0xff]   ;;  %v2409_v36 = vld [vmem:[#allocation5 + $0x90] sm:$0xff]   ;;  %p2626_p7 = pnand %p2625_p3, %p2619_p8 }
  0x61   : > { %1954 = vmatprep.subr.bf16.mxu0 %v2372_v6  ;;  %2287 = vmatprep.subr.bf16.mxu1 %v2372_v6  ;;  %v2401_v29 = vld [vmem:[#allocation5 + $0x108] sm:$0xff]   ;;  %v2402_v34 = vld [vmem:[%s2860_s9 + $0x64] ss:$24 sps:$4 sm:$0xff]   ;;  %v2411_v37 = vld [vmem:[#allocation5 + $0x110] sm:$0xff]  }
  0x62   : > { %v2396_v31 = vld [vmem:[%s2860_s9 + $0x30] ss:$24 sps:$4 sm:$0xff]   ;;  %v2404_v35 = vld [vmem:[%s2860_s9 + $0x1e4] ss:$24 sps:$4 sm:$0xff]   ;;  %v2406_v40 = vld [vmem:[%s2860_s9 + $0x60] ss:$24 sps:$4 sm:$0xff]  }
  0x63   : > { %v2397_v32 = vld [vmem:[%s2860_s9 + $0x1b0] ss:$24 sps:$4 sm:$0xff]   ;;  %v2418_v38 = vld [vmem:[#allocation5 + $0xd8] sm:$0xff]   ;;  %v2412_v44 = vld [vmem:[%s2860_s9 + $0x94] ss:$24 sps:$4 sm:$0xff]  }
  0x64   : > { %1955 = vmatpush3.bf16.msra.mxu0 %v2373_v7  ;;  %2295 = vmatpush3.bf16.msra.mxu1 %v2373_v7  ;;  %v2420_v39 = vld [vmem:[#allocation5 + $0x158] sm:$0xff]   ;;  %v2414_v45 = vld [vmem:[%s2860_s9 + $0x214] ss:$24 sps:$4 sm:$0xff]   ;;  %v2428_v46 = vld [vmem:[#allocation5 + $0xe0] sm:$0xff]  }
  0x65   : > { %1956 = vmatprep.subr.bf16.mxu0 %v2374_v8  ;;  %2288 = vmatprep.subr.bf16.mxu1 %v2374_v8  ;;  %v2407_v41 = vld [vmem:[%s2860_s9 + $0x1e0] ss:$24 sps:$4 sm:$0xff]   ;;  %v2416_v50 = vld [vmem:[%s2860_s9 + $0x90] ss:$24 sps:$4 sm:$0xff]   ;;  %v2422_v53 = vld [vmem:[%s2860_s9 + $0xc4] ss:$24 sps:$4 sm:$0xff]  }
  0x66   : > { %v2419_v42 = vld [vmem:[#allocation5 + $0x98] sm:$0xff]   ;;  %v2429_v47 = vld [vmem:[#allocation5 + $0xa0] sm:$0xff]   ;;  %v2417_v51 = vld [vmem:[%s2860_s9 + $0x210] ss:$24 sps:$4 sm:$0xff]  }
  0x67   : > { %v2421_v43 = vld [vmem:[#allocation5 + $0x118] sm:$0xff]   ;;  %v2430_v48 = vld [vmem:[#allocation5 + $0x160] sm:$0xff]   ;;  %v2438_v52 = vld [vmem:[#allocation5 + $0xe8] sm:$0xff]  }
  0x68   : > { %1957 = vmatpush3.bf16.msra.mxu0 %v2375_v9  ;;  %2296 = vmatpush3.bf16.msra.mxu1 %v2375_v9  ;;  %v2431_v49 = vld [vmem:[#allocation5 + $0x120] sm:$0xff]   ;;  %v2439_v55 = vld [vmem:[#allocation5 + $0xa8] sm:$0xff]   ;;  %v2448_v58 = vld [vmem:[#allocation5 + $0xf0] sm:$0xff]  }
  0x69   : > { %1958 = vmatprep.subr.bf16.mxu0 %v2376_v10  ;;  %2289 = vmatprep.subr.bf16.mxu1 %v2376_v10  ;;  %v2424_v54 = vld [vmem:[%s2860_s9 + $0x244] ss:$24 sps:$4 sm:$0xff]   ;;  %v2440_v56 = vld [vmem:[#allocation5 + $0x168] sm:$0xff]   ;;  %v2426_v59 = vld [vmem:[%s2860_s9 + $0xc0] ss:$24 sps:$4 sm:$0xff]  }
  0x6a   : > { %v2441_v57 = vld [vmem:[#allocation5 + $0x128] sm:$0xff]   ;;  %v2427_v60 = vld [vmem:[%s2860_s9 + $0x240] ss:$24 sps:$4 sm:$0xff]   ;;  %v2449_v61 = vld [vmem:[#allocation5 + $0xb0] sm:$0xff]  }
  0x6b   : > { %v2432_v62 = vld [vmem:[%s2860_s9 + $0xf4] ss:$24 sps:$4 sm:$0xff]   ;;  %v2458_v2 = vld [vmem:[#allocation5 + $0xf8] sm:$0xff]   ;;  %v2436_v6 = vld [vmem:[%s2860_s9 + $0xf0] ss:$24 sps:$4 sm:$0xff]  }
  0x6c   : > { %1959 = vmatpush3.bf16.msra.mxu0 %v2377_v13  ;;  %2297 = vmatpush3.bf16.msra.mxu1 %v2377_v13  ;;  %v2450_v63 = vld [vmem:[#allocation5 + $0x170] sm:$0xff]   ;;  %v2459_v3 = vld [vmem:[#allocation5 + $0xb8] sm:$0xff]  }
  0x6d   : > { %1960 = vmatprep.subr.bf16.mxu0 %v2378_v14  ;;  %2290 = vmatprep.subr.bf16.mxu1 %v2378_v14  ;;  %v2451_v0 = vld [vmem:[#allocation5 + $0x130] sm:$0xff]   ;;  %v2460_v4 = vld [vmem:[#allocation5 + $0x178] sm:$0xff]  }
  0x6e   : > { %v2434_v1 = vld [vmem:[%s2860_s9 + $0x274] ss:$24 sps:$4 sm:$0xff]   ;;  %v2461_v5 = vld [vmem:[#allocation5 + $0x138] sm:$0xff]   ;;  %v2437_v7 = vld [vmem:[%s2860_s9 + $0x270] ss:$24 sps:$4 sm:$0xff]  }
  0x6f   : > { %v2442_v8 = vld [vmem:[%s2860_s9 + $0x124] ss:$24 sps:$4 sm:$0xff]   ;;  %v2446_v10 = vld [vmem:[%s2860_s9 + $0x120] ss:$24 sps:$4 sm:$0xff]   ;;  %v2452_v12 = vld [vmem:[%s2860_s9 + $0x154] ss:$24 sps:$4 sm:$0xff]  }
  0x70   : > { %1961 = vmatpush3.bf16.msra.mxu0 %v2379_v15  ;;  %2298 = vmatpush3.bf16.msra.mxu1 %v2379_v15  ;;  %v2444_v9 = vld [vmem:[%s2860_s9 + $0x2a4] ss:$24 sps:$4 sm:$0xff]   ;;  %v2447_v11 = vld [vmem:[%s2860_s9 + $0x2a0] ss:$24 sps:$4 sm:$0xff]   ;;  %v2454_v13 = vld [vmem:[%s2860_s9 + $0x2d4] ss:$24 sps:$4 sm:$0xff]  }
  0x71   : > { %1962 = vmatprep.subr.bf16.mxu0 %v2380_v16  ;;  %2291 = vmatprep.subr.bf16.mxu1 %v2380_v16  ;;  %v2456_v14 = vld [vmem:[%s2860_s9 + $0x150] ss:$24 sps:$4 sm:$0xff]   ;;  %v2464_v16 = vld [vmem:[%s2860_s9 + $0xc] ss:$24 sps:$4 sm:$0xff]  }
  0x72   : > { %v2457_v15 = vld [vmem:[%s2860_s9 + $0x2d0] ss:$24 sps:$4 sm:$0xff]  }
  0x74   : > { %1963 = vmatpush3.bf16.msra.mxu0 %v2381_v17  ;;  %2299 = vmatpush3.bf16.msra.mxu1 %v2381_v17  ;;  %v2467_v17 = vld [vmem:[%s2860_s9 + $0x14] ss:$24 sps:$4 sm:$0xff]  }
  0x75   : > { %2060 = vmatprep.subr.bf16.mxu1 %v2388_v18  ;;  %2172 = vmatprep.subr.bf16.mxu0 %v2390_v20  ;;  %v2462_v18 = vld [vmem:[%s2860_s9 + $0x8] ss:$24 sps:$4 sm:$0xff]   ;;  %v2468_v20 = vld [vmem:[%s2860_s9 + $0x3c] ss:$24 sps:$4 sm:$0xff]  }
  0x77   : > { %1208 = vmatmul.mubr.bf16.vlgmr.msra.gmra.mrb[0].mxu0 %v2382_v19  ;;  %1272 = vmatmul.mubr.bf16.vlgmr.msra.gmra.mrb[0].mxu1 %v2385_v21  ;;  %v2465_v19 = vld [vmem:[%s2860_s9 + $0x10] ss:$24 sps:$4 sm:$0xff]   ;;  %v2470_v21 = vld [vmem:[%s2860_s9 + $0x44] ss:$24 sps:$4 sm:$0xff]  }
  0x78   : > { %2061 = vmatpush3.bf16.msra.mxu1 %v2389_v22  ;;  %2173 = vmatpush3.bf16.msra.mxu0 %v2391_v23  ;;  %v2472_v22 = vld [vmem:[%s2860_s9 + $0x38] ss:$24 sps:$4 sm:$0xff]  }
  0x79   : > { %1215 = vmatprep.mubr.bf16.mxu0 %v2392_v24  ;;  %1279 = vmatprep.mubr.bf16.mxu1 %v2394_v25  ;;  %v2473_v23 = vld [vmem:[%s2860_s9 + $0x40] ss:$24 sps:$4 sm:$0xff]   ;;  %v2474_v24 = vld [vmem:[%s2860_s9 + $0x6c] ss:$24 sps:$4 sm:$0xff]  }
  0x7a   : > { %2062 = vmatprep.subr.bf16.mxu1 %v2398_v26  ;;  %2174 = vmatprep.subr.bf16.mxu0 %v2400_v28  ;;  %v2476_v25 = vld [vmem:[%s2860_s9 + $0x74] ss:$24 sps:$4 sm:$0xff]   ;;  %v2478_v26 = vld [vmem:[%s2860_s9 + $0x68] ss:$24 sps:$4 sm:$0xff]  }
  0x7b   : > { %v2480_v28 = vld [vmem:[%s2860_s9 + $0x9c] ss:$24 sps:$4 sm:$0xff]  }
  0x7c   : > { %2063 = vmatpush3.bf16.msra.mxu1 %v2399_v27  ;;  %2175 = vmatpush3.bf16.msra.mxu0 %v2401_v29  ;;  %v2479_v27 = vld [vmem:[%s2860_s9 + $0x70] ss:$24 sps:$4 sm:$0xff]   ;;  %v2482_v29 = vld [vmem:[%s2860_s9 + $0xa4] ss:$24 sps:$4 sm:$0xff]  }
  0x7d   : > { %2064 = vmatprep.subr.bf16.mxu1 %v2408_v30  ;;  %2176 = vmatprep.subr.bf16.mxu0 %v2410_v33  ;;  %v2484_v30 = vld [vmem:[%s2860_s9 + $0x98] ss:$24 sps:$4 sm:$0xff]   ;;  %v2488_v33 = vld [vmem:[%s2860_s9 + $0xd4] ss:$24 sps:$4 sm:$0xff]  }
  0x7f   : > { %1216 = vmatmul.mubr.bf16.gmra.mrb[4].mxu0 %v2396_v31  ;;  %1280 = vmatmul.mubr.bf16.gmra.mrb[4].mxu1 %v2397_v32  ;;  %v2485_v31 = vld [vmem:[%s2860_s9 + $0xa0] ss:$24 sps:$4 sm:$0xff]   ;;  %v2486_v32 = vld [vmem:[%s2860_s9 + $0xcc] ss:$24 sps:$4 sm:$0xff]  }
  0x80   : > { %1223 = vmatprep.mubr.bf16.mxu0 %v2402_v34  ;;  %1287 = vmatprep.mubr.bf16.mxu1 %v2404_v35  ;;  %v2490_v34 = vld [vmem:[%s2860_s9 + $0xc8] ss:$24 sps:$4 sm:$0xff]  }
  0x81   : > { %2065 = vmatpush3.bf16.msra.mxu1 %v2409_v36  ;;  %2177 = vmatpush3.bf16.msra.mxu0 %v2411_v37  ;;  %v2491_v35 = vld [vmem:[%s2860_s9 + $0xd0] ss:$24 sps:$4 sm:$0xff]   ;;  %v2492_v36 = vld [vmem:[%s2860_s9 + $0xfc] ss:$24 sps:$4 sm:$0xff]  }
  0x82   : > { %2066 = vmatprep.subr.bf16.mxu1 %v2418_v38  ;;  %2178 = vmatprep.subr.bf16.mxu0 %v2420_v39  ;;  %v2494_v37 = vld [vmem:[%s2860_s9 + $0x104] ss:$24 sps:$4 sm:$0xff]   ;;  %v2496_v38 = vld [vmem:[%s2860_s9 + $0xf8] ss:$24 sps:$4 sm:$0xff]  }
  0x83   : > { %v2497_v39 = vld [vmem:[%s2860_s9 + $0x100] ss:$24 sps:$4 sm:$0xff]  }
  0x85   : > { %2067 = vmatpush3.bf16.msra.mxu1 %v2419_v42  ;;  %2179 = vmatpush3.bf16.msra.mxu0 %v2421_v43  ;;  %v2502_v42 = vld [vmem:[%s2860_s9 + $0x128] ss:$24 sps:$4 sm:$0xff]  }
  0x86   : > { %2068 = vmatprep.subr.bf16.mxu1 %v2428_v46  ;;  %2180 = vmatprep.subr.bf16.mxu0 %v2430_v48  ;;  %v2503_v43 = vld [vmem:[%s2860_s9 + $0x130] ss:$24 sps:$4 sm:$0xff]   ;;  %v2510_v48 = vld [vmem:[%s2860_s9 + $0x18c] ss:$24 sps:$4 sm:$0xff]  }
  0x87   : > { %1224 = vmatmul.mubr.bf16.gmra.mrb[8].mxu0 %v2406_v40  ;;  %1288 = vmatmul.mubr.bf16.gmra.mrb[8].mxu1 %v2407_v41  ;;  %v2498_v40 = vld [vmem:[%s2860_s9 + $0x12c] ss:$24 sps:$4 sm:$0xff]   ;;  %v2508_v46 = vld [vmem:[%s2860_s9 + $0x158] ss:$24 sps:$4 sm:$0xff]  }
  0x88   : > { %1231 = vmatprep.mubr.bf16.mxu0 %v2412_v44  ;;  %1295 = vmatprep.mubr.bf16.mxu1 %v2414_v45  ;;  %v2500_v41 = vld [vmem:[%s2860_s9 + $0x134] ss:$24 sps:$4 sm:$0xff]   ;;  %v2506_v45 = vld [vmem:[%s2860_s9 + $0x164] ss:$24 sps:$4 sm:$0xff]  }
  0x89   : > { %2069 = vmatpush3.bf16.msra.mxu1 %v2429_v47  ;;  %2181 = vmatpush3.bf16.msra.mxu0 %v2431_v49  ;;  %v2504_v44 = vld [vmem:[%s2860_s9 + $0x15c] ss:$24 sps:$4 sm:$0xff]   ;;  %v2509_v47 = vld [vmem:[%s2860_s9 + $0x160] ss:$24 sps:$4 sm:$0xff]  }
  0x8a   : > { %2070 = vmatprep.subr.bf16.mxu1 %v2438_v52  ;;  %2182 = vmatprep.subr.bf16.mxu0 %v2440_v56  ;;  %v2512_v49 = vld [vmem:[%s2860_s9 + $0x194] ss:$24 sps:$4 sm:$0xff]  }
  0x8b   : > { %v2516_v52 = vld [vmem:[%s2860_s9 + $0x1bc] ss:$24 sps:$4 sm:$0xff]   ;;  %v2522_v56 = vld [vmem:[%s2860_s9 + $0x1ec] ss:$24 sps:$4 sm:$0xff]  }
  0x8d   : > { %2071 = vmatpush3.bf16.msra.mxu1 %v2439_v55  ;;  %2183 = vmatpush3.bf16.msra.mxu0 %v2441_v57  ;;  %v2521_v55 = vld [vmem:[%s2860_s9 + $0x1c0] ss:$24 sps:$4 sm:$0xff]   ;;  %v2524_v57 = vld [vmem:[%s2860_s9 + $0x1f4] ss:$24 sps:$4 sm:$0xff]  }
  0x8e   : > { %2072 = vmatprep.subr.bf16.mxu1 %v2448_v58  ;;  %2184 = vmatprep.subr.bf16.mxu0 %v2450_v63  ;;  %v2526_v58 = vld [vmem:[%s2860_s9 + $0x1e8] ss:$24 sps:$4 sm:$0xff]  }
  0x8f   : > { %1232 = vmatmul.mubr.bf16.gmra.mrb[12].mxu0 %v2416_v50  ;;  %1296 = vmatmul.mubr.bf16.gmra.mrb[12].mxu1 %v2417_v51  ;;  %v2514_v50 = vld [vmem:[%s2860_s9 + $0x188] ss:$24 sps:$4 sm:$0xff]  }
  0x90   : > { %1239 = vmatprep.mubr.bf16.mxu0 %v2422_v53  ;;  %1303 = vmatprep.mubr.bf16.mxu1 %v2424_v54  ;;  %v2515_v51 = vld [vmem:[%s2860_s9 + $0x190] ss:$24 sps:$4 sm:$0xff]   ;;  %v2518_v53 = vld [vmem:[%s2860_s9 + $0x1c4] ss:$24 sps:$4 sm:$0xff]   ;;  %v2533_v63 = vld [vmem:[%s2860_s9 + $0x220] ss:$24 sps:$4 sm:$0xff]  }
  0x91   : > { %2073 = vmatpush3.bf16.msra.mxu1 %v2449_v61  ;;  %2185 = vmatpush3.bf16.msra.mxu0 %v2451_v0  ;;  %v2520_v54 = vld [vmem:[%s2860_s9 + $0x1b8] ss:$24 sps:$4 sm:$0xff]   ;;  %v2530_v61 = vld [vmem:[%s2860_s9 + $0x224] ss:$24 sps:$4 sm:$0xff]  }
  0x92   : > { %2074 = vmatprep.subr.bf16.mxu1 %v2458_v2  ;;  %2186 = vmatprep.subr.bf16.mxu0 %v2460_v4  ;;  %v2534_v0 = vld [vmem:[%s2860_s9 + $0x24c] ss:$24 sps:$4 sm:$0xff]   ;;  %v2538_v2 = vld [vmem:[%s2860_s9 + $0x248] ss:$24 sps:$4 sm:$0xff]   ;;  %v2540_v4 = vld [vmem:[%s2860_s9 + $0x27c] ss:$24 sps:$4 sm:$0xff]  }
  0x95   : > { %2075 = vmatpush3.bf16.msra.mxu1 %v2459_v3  ;;  %2187 = vmatpush3.bf16.msra.mxu0 %v2461_v5  ;;  %v2539_v3 = vld [vmem:[%s2860_s9 + $0x250] ss:$24 sps:$4 sm:$0xff]   ;;  %v2542_v5 = vld [vmem:[%s2860_s9 + $0x284] ss:$24 sps:$4 sm:$0xff]  }
  0x97   : > { %1240 = vmatmul.mubr.bf16.gmra.mrb[16].mxu0 %v2426_v59  ;;  %1304 = vmatmul.mubr.bf16.gmra.mrb[16].mxu1 %v2427_v60  ;;  %v2527_v59 = vld [vmem:[%s2860_s9 + $0x1f0] ss:$24 sps:$4 sm:$0xff]   ;;  %v2528_v60 = vld [vmem:[%s2860_s9 + $0x21c] ss:$24 sps:$4 sm:$0xff]  }
  0x98   : > { %1247 = vmatprep.mubr.bf16.mxu0 %v2432_v62  ;;  %1311 = vmatprep.mubr.bf16.mxu1 %v2434_v1  ;;  %v2532_v62 = vld [vmem:[%s2860_s9 + $0x218] ss:$24 sps:$4 sm:$0xff]   ;;  %v2536_v1 = vld [vmem:[%s2860_s9 + $0x254] ss:$24 sps:$4 sm:$0xff]  }
  0x9f   : > { %1248 = vmatmul.mubr.bf16.gmra.mrb[20].mxu0 %v2436_v6  ;;  %1312 = vmatmul.mubr.bf16.gmra.mrb[20].mxu1 %v2437_v7  ;;  %v2544_v6 = vld [vmem:[%s2860_s9 + $0x278] ss:$24 sps:$4 sm:$0xff]  }
  0xa0   : > { %1255 = vmatprep.mubr.bf16.mxu0 %v2442_v8  ;;  %1319 = vmatprep.mubr.bf16.mxu1 %v2444_v9  ;;  %v2545_v7 = vld [vmem:[%s2860_s9 + $0x280] ss:$24 sps:$4 sm:$0xff]   ;;  %v2546_v8 = vld [vmem:[%s2860_s9 + $0x2ac] ss:$24 sps:$4 sm:$0xff]  }
  0xa1   : > { %v2548_v9 = vld [vmem:[%s2860_s9 + $0x2b4] ss:$24 sps:$4 sm:$0xff]  }
  0xa7   : > { %1256 = vmatmul.mubr.bf16.gmra.mrb[24].mxu0 %v2446_v10  ;;  %1320 = vmatmul.mubr.bf16.gmra.mrb[24].mxu1 %v2447_v11  ;;  %v2550_v10 = vld [vmem:[%s2860_s9 + $0x2a8] ss:$24 sps:$4 sm:$0xff]  }
  0xa8   : > { %1263 = vmatprep.mubr.bf16.mxu0 %v2452_v12  ;;  %1327 = vmatprep.mubr.bf16.mxu1 %v2454_v13  ;;  %v2551_v11 = vld [vmem:[%s2860_s9 + $0x2b0] ss:$24 sps:$4 sm:$0xff]   ;;  %v2552_v12 = vld [vmem:[%s2860_s9 + $0x2dc] ss:$24 sps:$4 sm:$0xff]  }
  0xa9   : > { %v2554_v13 = vld [vmem:[%s2860_s9 + $0x2e4] ss:$24 sps:$4 sm:$0xff]  }
  0xaf   : > { %1264 = vmatmul.mubr.bf16.gmra.mrb[28].mxu0 %v2456_v14  ;;  %1328 = vmatmul.mubr.bf16.gmra.mrb[28].mxu1 %v2457_v15  ;;  %v2556_v14 = vld [vmem:[%s2860_s9 + $0x2d8] ss:$24 sps:$4 sm:$0xff]  }
  0xb0   : > { %1368 = vmatprep.mubr.bf16.mxu1 %v2464_v16  ;;  %1529 = vmatprep.mubr.bf16.mxu0 %v2467_v17  ;;  %v2557_v15 = vld [vmem:[%s2860_s9 + $0x2e0] ss:$24 sps:$4 sm:$0xff]  }
  0xb7   : > { %1369 = vmatmul.mubr.bf16.vlgmr.msra.gmra.mrb[32].mxu1 %v2462_v18  ;;  %1530 = vmatmul.mubr.bf16.vlgmr.msra.gmra.mrb[32].mxu0 %v2465_v19  ;;  %v2969_v18 = vld [vmem:[%s3187_s2] ss:$0 sm:$0xff] }
  0xb8   : > { %1376 = vmatprep.mubr.bf16.mxu1 %v2468_v20  ;;  %1537 = vmatprep.mubr.bf16.mxu0 %v2470_v21 }
  0xbf   : > { %1377 = vmatmul.mubr.bf16.gmra.mrb[36].mxu1 %v2472_v22  ;;  %1538 = vmatmul.mubr.bf16.gmra.mrb[36].mxu0 %v2473_v23 }
  0xc0   : > { %1384 = vmatprep.mubr.bf16.mxu1 %v2474_v24  ;;  %1545 = vmatprep.mubr.bf16.mxu0 %v2476_v25 }
  0xc7   : > { %1385 = vmatmul.mubr.bf16.gmra.mrb[40].mxu1 %v2478_v26  ;;  %1546 = vmatmul.mubr.bf16.gmra.mrb[40].mxu0 %v2479_v27 }
  0xc8   : > { %1392 = vmatprep.mubr.bf16.mxu1 %v2480_v28  ;;  %1553 = vmatprep.mubr.bf16.mxu0 %v2482_v29 }
  0xcf   : > { %1393 = vmatmul.mubr.bf16.gmra.mrb[44].mxu1 %v2484_v30  ;;  %1554 = vmatmul.mubr.bf16.gmra.mrb[44].mxu0 %v2485_v31 }
  0xd0   : > { %1400 = vmatprep.mubr.bf16.mxu1 %v2486_v32  ;;  %1561 = vmatprep.mubr.bf16.mxu0 %v2488_v33 }
  0xd7   : > { %1401 = vmatmul.mubr.bf16.gmra.mrb[48].mxu1 %v2490_v34  ;;  %1562 = vmatmul.mubr.bf16.gmra.mrb[48].mxu0 %v2491_v35 }
  0xd8   : > { %1408 = vmatprep.mubr.bf16.mxu1 %v2492_v36  ;;  %1569 = vmatprep.mubr.bf16.mxu0 %v2494_v37 }
  0xdf   : > { %1409 = vmatmul.mubr.bf16.gmra.mrb[52].mxu1 %v2496_v38  ;;  %1570 = vmatmul.mubr.bf16.gmra.mrb[52].mxu0 %v2497_v39 }
  0xe0   : > { %1416 = vmatprep.mubr.bf16.mxu1 %v2498_v40  ;;  %1577 = vmatprep.mubr.bf16.mxu0 %v2500_v41 }
  0xe7   : > { %1417 = vmatmul.mubr.bf16.gmra.mrb[56].mxu1 %v2502_v42  ;;  %1578 = vmatmul.mubr.bf16.gmra.mrb[56].mxu0 %v2503_v43 }
  0xe8   : > { %1424 = vmatprep.mubr.bf16.mxu1 %v2504_v44  ;;  %1585 = vmatprep.mubr.bf16.mxu0 %v2506_v45 }
  0xef   : > { %1425 = vmatmul.mubr.bf16.gmra.mrb[60].mxu1 %v2508_v46  ;;  %1586 = vmatmul.mubr.bf16.gmra.mrb[60].mxu0 %v2509_v47 }
  0xf0   : > { %1432 = vmatprep.mubr.bf16.mxu1 %v2510_v48  ;;  %1593 = vmatprep.mubr.bf16.mxu0 %v2512_v49 }
  0xf7   : > { %1433 = vmatmul.mubr.bf16.gmra.mrb[64].mxu1 %v2514_v50  ;;  %1594 = vmatmul.mubr.bf16.gmra.mrb[64].mxu0 %v2515_v51 }
  0xf8   : > { %1440 = vmatprep.mubr.bf16.mxu1 %v2516_v52  ;;  %1601 = vmatprep.mubr.bf16.mxu0 %v2518_v53 }
  0xff   : > { %1441 = vmatmul.mubr.bf16.gmra.mrb[68].mxu1 %v2520_v54  ;;  %1602 = vmatmul.mubr.bf16.gmra.mrb[68].mxu0 %v2521_v55 }
 0x100   : > { %1448 = vmatprep.mubr.bf16.mxu1 %v2522_v56  ;;  %1609 = vmatprep.mubr.bf16.mxu0 %v2524_v57 }
 0x107   : > { %1449 = vmatmul.mubr.bf16.gmra.mrb[72].mxu1 %v2526_v58  ;;  %1610 = vmatmul.mubr.bf16.gmra.mrb[72].mxu0 %v2527_v59 }
 0x108   : > { %1456 = vmatprep.mubr.bf16.mxu1 %v2528_v60  ;;  %1617 = vmatprep.mubr.bf16.mxu0 %v2530_v61 }
 0x10f   : > { %1457 = vmatmul.mubr.bf16.gmra.mrb[76].mxu1 %v2532_v62  ;;  %1618 = vmatmul.mubr.bf16.gmra.mrb[76].mxu0 %v2533_v63 }
 0x110   : > { %1464 = vmatprep.mubr.bf16.mxu1 %v2534_v0  ;;  %1625 = vmatprep.mubr.bf16.mxu0 %v2536_v1 }
 0x117   : > { %1465 = vmatmul.mubr.bf16.gmra.mrb[80].mxu1 %v2538_v2  ;;  %1626 = vmatmul.mubr.bf16.gmra.mrb[80].mxu0 %v2539_v3 }
 0x118   : > { %1472 = vmatprep.mubr.bf16.mxu1 %v2540_v4  ;;  %1633 = vmatprep.mubr.bf16.mxu0 %v2542_v5 }
 0x11f   : > { %1473 = vmatmul.mubr.bf16.gmra.mrb[84].mxu1 %v2544_v6  ;;  %1634 = vmatmul.mubr.bf16.gmra.mrb[84].mxu0 %v2545_v7 }
 0x120   : > { %1480 = vmatprep.mubr.bf16.mxu1 %v2546_v8  ;;  %1641 = vmatprep.mubr.bf16.mxu0 %v2548_v9 }
 0x127   : > { %1481 = vmatmul.mubr.bf16.gmra.mrb[88].mxu1 %v2550_v10  ;;  %1642 = vmatmul.mubr.bf16.gmra.mrb[88].mxu0 %v2551_v11 }
 0x128   : > { %1488 = vmatprep.mubr.bf16.mxu1 %v2552_v12  ;;  %1649 = vmatprep.mubr.bf16.mxu0 %v2554_v13 }
 0x12f   : > { %1489 = vmatmul.mubr.bf16.gmra.mrb[92].mxu1 %v2556_v14  ;;  %1650 = vmatmul.mubr.bf16.gmra.mrb[92].mxu0 %v2557_v15 }
 0x14a   : > { %v1964_v16 = vpop.f32.mrb[0].mxu0  ;;  %v2012_v17 = vpop.f32.mrb[0].mxu1 }
 0x14b   : > { %v1965_v19 = vpop.f32.mrb[1].mxu0  ;;  %v2013_v20 = vpop.f32.mrb[1].mxu1 }
 0x14c   : > { %v2971_v21 = vadd.f32 %v1965_v19, %v1964_v16  ;;  %v2014_v22 = vadd.f32 %v2013_v20, %v2012_v17  ;;  %v1967_v23 = vpop.f32.mrb[2].mxu0  ;;  %v2015_v24 = vpop.f32.mrb[2].mxu1 }
 0x14d   : > { %v1968_v25 = vpop.f32.mrb[3].mxu0  ;;  %v2016_v26 = vpop.f32.mrb[3].mxu1 }
 0x14e   : > { %v2974_v27 = vadd.f32 %v2014_v22, %v2969_v18  ;;  %v2976_v28 = vadd.f32 %v1968_v25, %v1967_v23  ;;  %v2017_v29 = vadd.f32 %v2016_v26, %v2015_v24 }
 0x150   : > { %v2979_v30 = vadd.f32 %v2017_v29, %v2969_v18 }
 0x152   : > { %v1970_v31 = vpop.f32.mrb[4].mxu0  ;;  %v2018_v32 = vpop.f32.mrb[4].mxu1 }
 0x153   : > { %v1971_v33 = vpop.f32.mrb[5].mxu0  ;;  %v2019_v34 = vpop.f32.mrb[5].mxu1 }
 0x154   : > { %v2981_v35 = vadd.f32 %v1971_v33, %v1970_v31  ;;  %v2020_v36 = vadd.f32 %v2019_v34, %v2018_v32  ;;  %v1973_v37 = vpop.f32.mrb[6].mxu0  ;;  %v2021_v38 = vpop.f32.mrb[6].mxu1 }
 0x155   : > { %v1974_v39 = vpop.f32.mrb[7].mxu0  ;;  %v2022_v40 = vpop.f32.mrb[7].mxu1 }
 0x156   : > { %v2984_v41 = vadd.f32 %v2020_v36, %v2969_v18  ;;  %v2986_v42 = vadd.f32 %v1974_v39, %v1973_v37  ;;  %v2023_v43 = vadd.f32 %v2022_v40, %v2021_v38 }
 0x158   : > { %v2989_v44 = vadd.f32 %v2023_v43, %v2969_v18 }
 0x15a   : > { %v1976_v45 = vpop.f32.mrb[8].mxu0  ;;  %v2024_v46 = vpop.f32.mrb[8].mxu1 }
 0x15b   : > { %v1977_v47 = vpop.f32.mrb[9].mxu0  ;;  %v2025_v48 = vpop.f32.mrb[9].mxu1 }
 0x15c   : > { %v2991_v49 = vadd.f32 %v1977_v47, %v1976_v45  ;;  %v2026_v50 = vadd.f32 %v2025_v48, %v2024_v46  ;;  %v1979_v51 = vpop.f32.mrb[10].mxu0  ;;  %v2027_v52 = vpop.f32.mrb[10].mxu1 }
 0x15d   : > { %v1980_v53 = vpop.f32.mrb[11].mxu0  ;;  %v2028_v54 = vpop.f32.mrb[11].mxu1 }
 0x15e   : > { %v2994_v55 = vadd.f32 %v2026_v50, %v2969_v18  ;;  %v2996_v56 = vadd.f32 %v1980_v53, %v1979_v51  ;;  %v2029_v57 = vadd.f32 %v2028_v54, %v2027_v52 }
 0x160   : > { %v2999_v58 = vadd.f32 %v2029_v57, %v2969_v18 }
 0x162   : > { %v1982_v59 = vpop.f32.mrb[12].mxu0  ;;  %v2030_v60 = vpop.f32.mrb[12].mxu1 }
 0x163   : > { %v1983_v61 = vpop.f32.mrb[13].mxu0  ;;  %v2031_v62 = vpop.f32.mrb[13].mxu1 }
 0x164   : > { %v3001_v63 = vadd.f32 %v1983_v61, %v1982_v59  ;;  %v2032_v0 = vadd.f32 %v2031_v62, %v2030_v60  ;;  %v1985_v1 = vpop.f32.mrb[14].mxu0  ;;  %v2033_v2 = vpop.f32.mrb[14].mxu1 }
 0x165   : > { %v1986_v3 = vpop.f32.mrb[15].mxu0  ;;  %v2034_v4 = vpop.f32.mrb[15].mxu1 }
 0x166   : > { %v3004_v5 = vadd.f32 %v2032_v0, %v2969_v18  ;;  %v3006_v6 = vadd.f32 %v1986_v3, %v1985_v1  ;;  %v2035_v7 = vadd.f32 %v2034_v4, %v2033_v2 }
 0x168   : > { %v3009_v8 = vadd.f32 %v2035_v7, %v2969_v18 }
 0x16a   : > { %v1988_v9 = vpop.f32.mrb[16].mxu0  ;;  %v2036_v10 = vpop.f32.mrb[16].mxu1 }
 0x16b   : > { %v1989_v11 = vpop.f32.mrb[17].mxu0  ;;  %v2037_v12 = vpop.f32.mrb[17].mxu1 }
 0x16c   : > { %v3011_v13 = vadd.f32 %v1989_v11, %v1988_v9  ;;  %v2038_v14 = vadd.f32 %v2037_v12, %v2036_v10  ;;  %v1991_v15 = vpop.f32.mrb[18].mxu0  ;;  %v2039_v16 = vpop.f32.mrb[18].mxu1 }
 0x16d   : > { %v1992_v17 = vpop.f32.mrb[19].mxu0  ;;  %v2040_v19 = vpop.f32.mrb[19].mxu1 }
 0x16e   : > { %v3014_v20 = vadd.f32 %v2038_v14, %v2969_v18  ;;  %v3016_v22 = vadd.f32 %v1992_v17, %v1991_v15  ;;  %v2041_v23 = vadd.f32 %v2040_v19, %v2039_v16 }
 0x170   : > { %v3019_v24 = vadd.f32 %v2041_v23, %v2969_v18 }
 0x172   : > { %v1994_v25 = vpop.f32.mrb[20].mxu0  ;;  %v2042_v26 = vpop.f32.mrb[20].mxu1 }
 0x173   : > { %v1995_v29 = vpop.f32.mrb[21].mxu0  ;;  %v2043_v31 = vpop.f32.mrb[21].mxu1 }
 0x174   : > { %v3021_v32 = vadd.f32 %v1995_v29, %v1994_v25  ;;  %v2044_v33 = vadd.f32 %v2043_v31, %v2042_v26  ;;  %v1997_v34 = vpop.f32.mrb[22].mxu0  ;;  %v2045_v36 = vpop.f32.mrb[22].mxu1  ;;  %v1210_v31 = vadd.f32 %v2971_v21, %v2969_v18 }
 0x175   : > { %v1998_v37 = vpop.f32.mrb[23].mxu0  ;;  %v2046_v38 = vpop.f32.mrb[23].mxu1 }
 0x176   : > { %v3024_v39 = vadd.f32 %v2044_v33, %v2969_v18  ;;  %v3026_v40 = vadd.f32 %v1998_v37, %v1997_v34  ;;  %v2047_v43 = vadd.f32 %v2046_v38, %v2045_v36 }
 0x178   : > { %v3029_v45 = vadd.f32 %v2047_v43, %v2969_v18 }
 0x17a   : > { %v2000_v46 = vpop.f32.mrb[24].mxu0  ;;  %v2048_v47 = vpop.f32.mrb[24].mxu1 }
 0x17b   : > { %v2001_v48 = vpop.f32.mrb[25].mxu0  ;;  %v2049_v50 = vpop.f32.mrb[25].mxu1 }
 0x17c   : > { %v3031_v51 = vadd.f32 %v2001_v48, %v2000_v46  ;;  %v2050_v52 = vadd.f32 %v2049_v50, %v2048_v47  ;;  %v2003_v53 = vpop.f32.mrb[26].mxu0  ;;  %v2051_v54 = vpop.f32.mrb[26].mxu1  ;;  %v1213_v46 = vadd.f32 %v2976_v28, %v2969_v18 }
 0x17d   : > { %v2004_v57 = vpop.f32.mrb[27].mxu0  ;;  %v2052_v59 = vpop.f32.mrb[27].mxu1 }
 0x17e   : > { %v3034_v60 = vadd.f32 %v2050_v52, %v2969_v18  ;;  %v3036_v61 = vadd.f32 %v2004_v57, %v2003_v53  ;;  %v2053_v62 = vadd.f32 %v2052_v59, %v2051_v54 }
 0x180   : > { %v3039_v0 = vadd.f32 %v2053_v62, %v2969_v18 }
 0x182   : > { %v2006_v1 = vpop.f32.mrb[28].mxu0  ;;  %v2054_v2 = vpop.f32.mrb[28].mxu1 }
 0x183   : > { %v2007_v3 = vpop.f32.mrb[29].mxu0  ;;  %v2055_v4 = vpop.f32.mrb[29].mxu1 }
 0x184   : > { %v3041_v7 = vadd.f32 %v2007_v3, %v2006_v1  ;;  %v2056_v9 = vadd.f32 %v2055_v4, %v2054_v2  ;;  %v2009_v10 = vpop.f32.mrb[30].mxu0  ;;  %v2057_v11 = vpop.f32.mrb[30].mxu1  ;;  %v1218_v1 = vadd.f32 %v2981_v35, %v2969_v18 }
 0x185   : > { %v2010_v12 = vpop.f32.mrb[31].mxu0  ;;  %v2058_v14 = vpop.f32.mrb[31].mxu1 }
 0x186   : > { %v3044_v15 = vadd.f32 %v2056_v9, %v2969_v18  ;;  %v3046_v16 = vadd.f32 %v2010_v12, %v2009_v10  ;;  %v2059_v17 = vadd.f32 %v2058_v14, %v2057_v11  ;;  %v1221_v11 = vadd.f32 %v2986_v42, %v2969_v18 }
 0x188   : > { %v3049_v19 = vadd.f32 %v2059_v17, %v2969_v18 }
 0x18a   : > { %v2076_v23 = vpop.f32.mrb[32].mxu1  ;;  %v2188_v25 = vpop.f32.mrb[32].mxu0 }
 0x18b   : > { %v2077_v26 = vpop.f32.mrb[33].mxu1  ;;  %v2189_v29 = vpop.f32.mrb[33].mxu0 }
 0x18c   : > { %v2078_v33 = vadd.f32 %v2077_v26, %v2076_v23  ;;  %v2190_v34 = vadd.f32 %v2189_v29, %v2188_v25  ;;  %v2079_v36 = vpop.f32.mrb[34].mxu1  ;;  %v2191_v37 = vpop.f32.mrb[34].mxu0 }
 0x18d   : > { %v2080_v38 = vpop.f32.mrb[35].mxu1  ;;  %v2192_v43 = vpop.f32.mrb[35].mxu0 }
 0x18e   : > { %v1371_v47 = vadd.f32 %v2078_v33, %v1210_v31  ;;  %v2081_v48 = vadd.f32 %v2080_v38, %v2079_v36  ;;  %v2193_v50 = vadd.f32 %v2192_v43, %v2191_v37 }
 0x190   : > { %v1532_v52 = vadd.f32 %v2190_v34, %v1371_v47  ;;  %v1374_v53 = vadd.f32 %v2081_v48, %v1213_v46  ;;  %v1226_v34 = vadd.f32 %v2991_v49, %v2969_v18  ;;  %v1229_v47 = vadd.f32 %v2996_v56, %v2969_v18 }
 0x192   : > { %1658 = vst [vmem:[%s3056_s22] sm:$0xff] %v1532_v52  ;;  %v1535_v21 = vadd.f32 %v2193_v50, %v1374_v53  ;;  %v2082_v54 = vpop.f32.mrb[36].mxu1  ;;  %v2194_v57 = vpop.f32.mrb[36].mxu0 }
 0x193   : > { %v2083_v59 = vpop.f32.mrb[37].mxu1  ;;  %v2195_v62 = vpop.f32.mrb[37].mxu0 }
 0x194   : > { %1659 = vst [vmem:[%s3056_s22 + $0x8] sm:$0xff] %v1535_v21  ;;  %v2084_v28 = vadd.f32 %v2083_v59, %v2082_v54  ;;  %v2196_v2 = vadd.f32 %v2195_v62, %v2194_v57  ;;  %v2085_v3 = vpop.f32.mrb[38].mxu1  ;;  %v2197_v4 = vpop.f32.mrb[38].mxu0 }
 0x195   : > { %v2086_v9 = vpop.f32.mrb[39].mxu1  ;;  %v2198_v10 = vpop.f32.mrb[39].mxu0 }
 0x196   : > { %v1379_v12 = vadd.f32 %v2084_v28, %v1218_v1  ;;  %v2087_v14 = vadd.f32 %v2086_v9, %v2085_v3  ;;  %v2199_v17 = vadd.f32 %v2198_v10, %v2197_v4  ;;  %v1234_v1 = vadd.f32 %v3001_v63, %v2969_v18 }
 0x197   : > { %v1237_v10 = vadd.f32 %v3006_v6, %v2969_v18 }
 0x198   : > { %v1540_v23 = vadd.f32 %v2196_v2, %v1379_v12  ;;  %v1382_v25 = vadd.f32 %v2087_v14, %v1221_v11 }
 0x19a   : > { %1660 = vst [vmem:[%s3056_s22 + $0x10] sm:$0xff] %v1540_v23  ;;  %v1543_v26 = vadd.f32 %v2199_v17, %v1382_v25  ;;  %v2088_v29 = vpop.f32.mrb[40].mxu1  ;;  %v2200_v35 = vpop.f32.mrb[40].mxu0 }
 0x19b   : > { %v2089_v31 = vpop.f32.mrb[41].mxu1  ;;  %v2201_v33 = vpop.f32.mrb[41].mxu0 }
 0x19c   : > { %1661 = vst [vmem:[%s3056_s22 + $0x18] sm:$0xff] %v1543_v26  ;;  %v2090_v36 = vadd.f32 %v2089_v31, %v2088_v29  ;;  %v2202_v37 = vadd.f32 %v2201_v33, %v2200_v35  ;;  %v2091_v38 = vpop.f32.mrb[42].mxu1  ;;  %v2203_v42 = vpop.f32.mrb[42].mxu0  ;;  %v1242_v31 = vadd.f32 %v3011_v13, %v2969_v18 }
 0x19d   : > { %v2092_v43 = vpop.f32.mrb[43].mxu1  ;;  %v2204_v46 = vpop.f32.mrb[43].mxu0 }
 0x19e   : > { %v1387_v48 = vadd.f32 %v2090_v36, %v1226_v34  ;;  %v2093_v50 = vadd.f32 %v2092_v43, %v2091_v38  ;;  %v2205_v52 = vadd.f32 %v2204_v46, %v2203_v42  ;;  %v1245_v42 = vadd.f32 %v3016_v22, %v2969_v18 }
 0x1a0   : > { %v1548_v53 = vadd.f32 %v2202_v37, %v1387_v48  ;;  %v1390_v21 = vadd.f32 %v2093_v50, %v1229_v47 }
 0x1a2   : > { %1662 = vst [vmem:[%s3056_s22 + $0x20] sm:$0xff] %v1548_v53  ;;  %v1551_v54 = vadd.f32 %v2205_v52, %v1390_v21  ;;  %v2094_v57 = vpop.f32.mrb[44].mxu1  ;;  %v2206_v49 = vpop.f32.mrb[44].mxu0 }
 0x1a3   : > { %v2095_v59 = vpop.f32.mrb[45].mxu1  ;;  %v2207_v62 = vpop.f32.mrb[45].mxu0 }
 0x1a4   : > { %1663 = vst [vmem:[%s3056_s22 + $0x28] sm:$0xff] %v1551_v54  ;;  %v2096_v28 = vadd.f32 %v2095_v59, %v2094_v57  ;;  %v2208_v2 = vadd.f32 %v2207_v62, %v2206_v49  ;;  %v2097_v3 = vpop.f32.mrb[46].mxu1  ;;  %v2209_v56 = vpop.f32.mrb[46].mxu0  ;;  %v1250_v57 = vadd.f32 %v3021_v32, %v2969_v18 }
 0x1a5   : > { %v2098_v4 = vpop.f32.mrb[47].mxu1  ;;  %v2210_v9 = vpop.f32.mrb[47].mxu0 }
 0x1a6   : > { %v1395_v11 = vadd.f32 %v2096_v28, %v1234_v1  ;;  %v2099_v12 = vadd.f32 %v2098_v4, %v2097_v3  ;;  %v2211_v14 = vadd.f32 %v2210_v9, %v2209_v56 }
 0x1a8   : > { %v1556_v17 = vadd.f32 %v2208_v2, %v1395_v11  ;;  %v1398_v23 = vadd.f32 %v2099_v12, %v1237_v10  ;;  %v1253_v2 = vadd.f32 %v3026_v40, %v2969_v18 }
 0x1aa   : > { %1664 = vst [vmem:[%s3056_s22 + $0x30] sm:$0xff] %v1556_v17  ;;  %v1559_v25 = vadd.f32 %v2211_v14, %v1398_v23  ;;  %v2100_v26 = vpop.f32.mrb[48].mxu1  ;;  %v2212_v63 = vpop.f32.mrb[48].mxu0  ;;  %v1258_v23 = vadd.f32 %v3031_v51, %v2969_v18 }
 0x1ab   : > { %v2101_v29 = vpop.f32.mrb[49].mxu1  ;;  %v2213_v35 = vpop.f32.mrb[49].mxu0 }
 0x1ac   : > { %1665 = vst [vmem:[%s3056_s22 + $0x38] sm:$0xff] %v1559_v25  ;;  %v2102_v33 = vadd.f32 %v2101_v29, %v2100_v26  ;;  %v2214_v34 = vadd.f32 %v2213_v35, %v2212_v63  ;;  %v2103_v36 = vpop.f32.mrb[50].mxu1  ;;  %v2215_v6 = vpop.f32.mrb[50].mxu0 }
 0x1ad   : > { %v2104_v37 = vpop.f32.mrb[51].mxu1  ;;  %v2216_v38 = vpop.f32.mrb[51].mxu0 }
 0x1ae   : > { %v1403_v43 = vadd.f32 %v2102_v33, %v1242_v31  ;;  %v2105_v46 = vadd.f32 %v2104_v37, %v2103_v36  ;;  %v2217_v47 = vadd.f32 %v2216_v38, %v2215_v6  ;;  %v1261_v31 = vadd.f32 %v3036_v61, %v2969_v18 }
 0x1b0   : > { %v1564_v48 = vadd.f32 %v2214_v34, %v1403_v43  ;;  %v1406_v50 = vadd.f32 %v2105_v46, %v1245_v42 }
 0x1b2   : > { %1666 = vst [vmem:[%s3056_s22 + $0x40] sm:$0xff] %v1564_v48  ;;  %v1567_v52 = vadd.f32 %v2217_v47, %v1406_v50  ;;  %v2106_v53 = vpop.f32.mrb[52].mxu1  ;;  %v2218_v13 = vpop.f32.mrb[52].mxu0  ;;  %v1266_v47 = vadd.f32 %v3041_v7, %v2969_v18 }
 0x1b3   : > { %v2107_v21 = vpop.f32.mrb[53].mxu1  ;;  %v2219_v54 = vpop.f32.mrb[53].mxu0 }
 0x1b4   : > { %1667 = vst [vmem:[%s3056_s22 + $0x48] sm:$0xff] %v1567_v52  ;;  %v2108_v49 = vadd.f32 %v2107_v21, %v2106_v53  ;;  %v2220_v59 = vadd.f32 %v2219_v54, %v2218_v13  ;;  %v2109_v62 = vpop.f32.mrb[54].mxu1  ;;  %v2221_v22 = vpop.f32.mrb[54].mxu0  ;;  %v1269_v21 = vadd.f32 %v3046_v16, %v2969_v18 }
 0x1b5   : > { %v2110_v1 = vpop.f32.mrb[55].mxu1  ;;  %v2222_v28 = vpop.f32.mrb[55].mxu0 }
 0x1b6   : > { %v1411_v3 = vadd.f32 %v2108_v49, %v1250_v57  ;;  %v2111_v56 = vadd.f32 %v2110_v1, %v2109_v62  ;;  %v2223_v4 = vadd.f32 %v2222_v28, %v2221_v22 }
 0x1b8   : > { %v1572_v9 = vadd.f32 %v2220_v59, %v1411_v3  ;;  %v1414_v10 = vadd.f32 %v2111_v56, %v1253_v2 }
 0x1ba   : > { %1668 = vst [vmem:[%s3056_s22 + $0x50] sm:$0xff] %v1572_v9  ;;  %v1575_v11 = vadd.f32 %v2223_v4, %v1414_v10  ;;  %v2112_v12 = vpop.f32.mrb[56].mxu1  ;;  %v2224_v32 = vpop.f32.mrb[56].mxu0 }
 0x1bb   : > { %v2113_v14 = vpop.f32.mrb[57].mxu1  ;;  %v2225_v17 = vpop.f32.mrb[57].mxu0 }
 0x1bc   : > { %1669 = vst [vmem:[%s3056_s22 + $0x58] sm:$0xff] %v1575_v11  ;;  %v2114_v25 = vadd.f32 %v2113_v14, %v2112_v12  ;;  %v2226_v26 = vadd.f32 %v2225_v17, %v2224_v32  ;;  %v2115_v63 = vpop.f32.mrb[58].mxu1  ;;  %v2227_v40 = vpop.f32.mrb[58].mxu0 }
 0x1bd   : > { %v2116_v29 = vpop.f32.mrb[59].mxu1  ;;  %v2228_v35 = vpop.f32.mrb[59].mxu0 }
 0x1be   : > { %v1419_v33 = vadd.f32 %v2114_v25, %v1258_v23  ;;  %v2117_v34 = vadd.f32 %v2116_v29, %v2115_v63  ;;  %v2229_v36 = vadd.f32 %v2228_v35, %v2227_v40 }
 0x1c0   : > { %v1580_v6 = vadd.f32 %v2226_v26, %v1419_v33  ;;  %v1422_v37 = vadd.f32 %v2117_v34, %v1261_v31 }
 0x1c2   : > { %1670 = vst [vmem:[%s3056_s22 + $0x60] sm:$0xff] %v1580_v6  ;;  %v1583_v38 = vadd.f32 %v2229_v36, %v1422_v37  ;;  %v2118_v42 = vpop.f32.mrb[60].mxu1  ;;  %v2230_v51 = vpop.f32.mrb[60].mxu0 }
 0x1c3   : > { %v2119_v43 = vpop.f32.mrb[61].mxu1  ;;  %v2231_v46 = vpop.f32.mrb[61].mxu0 }
 0x1c4   : > { %1671 = vst [vmem:[%s3056_s22 + $0x68] sm:$0xff] %v1583_v38  ;;  %v2120_v48 = vadd.f32 %v2119_v43, %v2118_v42  ;;  %v2232_v50 = vadd.f32 %v2231_v46, %v2230_v51  ;;  %v2121_v52 = vpop.f32.mrb[62].mxu1  ;;  %v2233_v61 = vpop.f32.mrb[62].mxu0 }
 0x1c5   : > { %v2122_v53 = vpop.f32.mrb[63].mxu1  ;;  %v2234_v13 = vpop.f32.mrb[63].mxu0 }
 0x1c6   : > { %v1427_v54 = vadd.f32 %v2120_v48, %v1266_v47  ;;  %v2123_v57 = vadd.f32 %v2122_v53, %v2121_v52  ;;  %v2235_v49 = vadd.f32 %v2234_v13, %v2233_v61 }
 0x1c8   : > { %v1588_v59 = vadd.f32 %v2232_v50, %v1427_v54  ;;  %v1430_v62 = vadd.f32 %v2123_v57, %v1269_v21 }
 0x1ca   : > { %1672 = vst [vmem:[%s3056_s22 + $0x70] sm:$0xff] %v1588_v59  ;;  %v1591_v22 = vadd.f32 %v2235_v49, %v1430_v62  ;;  %v2124_v1 = vpop.f32.mrb[64].mxu1  ;;  %v2236_v7 = vpop.f32.mrb[64].mxu0 }
 0x1cb   : > { %v2125_v28 = vpop.f32.mrb[65].mxu1  ;;  %v2237_v2 = vpop.f32.mrb[65].mxu0 }
 0x1cc   : > { %1673 = vst [vmem:[%s3056_s22 + $0x78] sm:$0xff] %v1591_v22  ;;  %v2126_v3 = vadd.f32 %v2125_v28, %v2124_v1  ;;  %v2238_v56 = vadd.f32 %v2237_v2, %v2236_v7  ;;  %v2127_v4 = vpop.f32.mrb[66].mxu1  ;;  %v2239_v9 = vpop.f32.mrb[66].mxu0 }
 0x1cd   : > { %v2128_v10 = vpop.f32.mrb[67].mxu1  ;;  %v2240_v18 = vpop.f32.mrb[67].mxu0 }
 0x1ce   : > { %v1435_v16 = vadd.f32 %v2126_v3, %v2974_v27  ;;  %v2129_v11 = vadd.f32 %v2128_v10, %v2127_v4  ;;  %v2241_v12 = vadd.f32 %v2240_v18, %v2239_v9 }
 0x1d0   : > { %v1596_v32 = vadd.f32 %v2238_v56, %v1435_v16  ;;  %v1438_v14 = vadd.f32 %v2129_v11, %v2979_v30 }
 0x1d2   : > { %1674 = vst [vmem:[%s3056_s22 + $0x80] sm:$0xff] %v1596_v32  ;;  %v1599_v17 = vadd.f32 %v2241_v12, %v1438_v14  ;;  %v2130_v23 = vpop.f32.mrb[68].mxu1  ;;  %v2242_v25 = vpop.f32.mrb[68].mxu0 }
 0x1d3   : > { %v2131_v26 = vpop.f32.mrb[69].mxu1  ;;  %v2243_v63 = vpop.f32.mrb[69].mxu0 }
 0x1d4   : > { %1675 = vst [vmem:[%s3056_s22 + $0x88] sm:$0xff] %v1599_v17  ;;  %v2132_v40 = vadd.f32 %v2131_v26, %v2130_v23  ;;  %v2244_v29 = vadd.f32 %v2243_v63, %v2242_v25  ;;  %v2133_v35 = vpop.f32.mrb[70].mxu1  ;;  %v2245_v31 = vpop.f32.mrb[70].mxu0 }
 0x1d5   : > { %v2134_v33 = vpop.f32.mrb[71].mxu1  ;;  %v2246_v27 = vpop.f32.mrb[71].mxu0 }
 0x1d6   : > { %v1443_v34 = vadd.f32 %v2132_v40, %v2984_v41  ;;  %v2135_v36 = vadd.f32 %v2134_v33, %v2133_v35  ;;  %v2247_v6 = vadd.f32 %v2246_v27, %v2245_v31 }
 0x1d8   : > { %v1604_v30 = vadd.f32 %v2244_v29, %v1443_v34  ;;  %v1446_v37 = vadd.f32 %v2135_v36, %v2989_v44 }
 0x1da   : > { %1676 = vst [vmem:[%s3056_s22 + $0x90] sm:$0xff] %v1604_v30  ;;  %v1607_v38 = vadd.f32 %v2247_v6, %v1446_v37  ;;  %v2136_v42 = vpop.f32.mrb[72].mxu1  ;;  %v2248_v51 = vpop.f32.mrb[72].mxu0 }
 0x1db   : > { %v2137_v43 = vpop.f32.mrb[73].mxu1  ;;  %v2249_v46 = vpop.f32.mrb[73].mxu0 }
 0x1dc   : > { %1677 = vst [vmem:[%s3056_s22 + $0x98] sm:$0xff] %v1607_v38  ;;  %v2138_v47 = vadd.f32 %v2137_v43, %v2136_v42  ;;  %v2250_v48 = vadd.f32 %v2249_v46, %v2248_v51  ;;  %v2139_v50 = vpop.f32.mrb[74].mxu1  ;;  %v2251_v52 = vpop.f32.mrb[74].mxu0 }
 0x1dd   : > { %v2140_v61 = vpop.f32.mrb[75].mxu1  ;;  %v2252_v41 = vpop.f32.mrb[75].mxu0 }
 0x1de   : > { %v1451_v53 = vadd.f32 %v2138_v47, %v2994_v55  ;;  %v2141_v13 = vadd.f32 %v2140_v61, %v2139_v50  ;;  %v2253_v21 = vadd.f32 %v2252_v41, %v2251_v52 }
 0x1e0   : > { %v1612_v44 = vadd.f32 %v2250_v48, %v1451_v53  ;;  %v1454_v54 = vadd.f32 %v2141_v13, %v2999_v58 }
 0x1e2   : > { %1678 = vst [vmem:[%s3056_s22 + $0xa0] sm:$0xff] %v1612_v44  ;;  %v1615_v57 = vadd.f32 %v2253_v21, %v1454_v54  ;;  %v2142_v49 = vpop.f32.mrb[76].mxu1  ;;  %v2254_v59 = vpop.f32.mrb[76].mxu0 }
 0x1e3   : > { %v2143_v62 = vpop.f32.mrb[77].mxu1  ;;  %v2255_v22 = vpop.f32.mrb[77].mxu0 }
 0x1e4   : > { %1679 = vst [vmem:[%s3056_s22 + $0xa8] sm:$0xff] %v1615_v57  ;;  %v2144_v1 = vadd.f32 %v2143_v62, %v2142_v49  ;;  %v2256_v7 = vadd.f32 %v2255_v22, %v2254_v59  ;;  %v2145_v28 = vpop.f32.mrb[78].mxu1  ;;  %v2257_v2 = vpop.f32.mrb[78].mxu0 }
 0x1e5   : > { %v2146_v3 = vpop.f32.mrb[79].mxu1  ;;  %v2258_v55 = vpop.f32.mrb[79].mxu0 }
 0x1e6   : > { %v1459_v56 = vadd.f32 %v2144_v1, %v3004_v5  ;;  %v2147_v4 = vadd.f32 %v2146_v3, %v2145_v28  ;;  %v2259_v9 = vadd.f32 %v2258_v55, %v2257_v2 }
 0x1e8   : > { %v1620_v58 = vadd.f32 %v2256_v7, %v1459_v56  ;;  %v1462_v10 = vadd.f32 %v2147_v4, %v3009_v8 }
 0x1ea   : > { %1680 = vst [vmem:[%s3056_s22 + $0xb0] sm:$0xff] %v1620_v58  ;;  %v1623_v18 = vadd.f32 %v2259_v9, %v1462_v10  ;;  %v2148_v16 = vpop.f32.mrb[80].mxu1  ;;  %v2260_v11 = vpop.f32.mrb[80].mxu0 }
 0x1eb   : > { %v2149_v12 = vpop.f32.mrb[81].mxu1  ;;  %v2261_v32 = vpop.f32.mrb[81].mxu0 }
 0x1ec   : > { %1681 = vst [vmem:[%s3056_s22 + $0xb8] sm:$0xff] %v1623_v18  ;;  %v2150_v14 = vadd.f32 %v2149_v12, %v2148_v16  ;;  %v2262_v17 = vadd.f32 %v2261_v32, %v2260_v11  ;;  %v2151_v23 = vpop.f32.mrb[82].mxu1  ;;  %v2263_v25 = vpop.f32.mrb[82].mxu0 }
 0x1ed   : > { %v2152_v26 = vpop.f32.mrb[83].mxu1  ;;  %v2264_v5 = vpop.f32.mrb[83].mxu0 }
 0x1ee   : > { %v1467_v63 = vadd.f32 %v2150_v14, %v3014_v20  ;;  %v2153_v40 = vadd.f32 %v2152_v26, %v2151_v23  ;;  %v2265_v29 = vadd.f32 %v2264_v5, %v2263_v25 }
 0x1f0   : > { %v1628_v8 = vadd.f32 %v2262_v17, %v1467_v63  ;;  %v1470_v35 = vadd.f32 %v2153_v40, %v3019_v24 }
 0x1f2   : > { %1682 = vst [vmem:[%s3056_s22 + $0xc0] sm:$0xff] %v1628_v8  ;;  %v1631_v31 = vadd.f32 %v2265_v29, %v1470_v35  ;;  %v2154_v33 = vpop.f32.mrb[84].mxu1  ;;  %v2266_v27 = vpop.f32.mrb[84].mxu0 }
 0x1f3   : > { %v2155_v34 = vpop.f32.mrb[85].mxu1  ;;  %v2267_v36 = vpop.f32.mrb[85].mxu0 }
 0x1f4   : > { %1683 = vst [vmem:[%s3056_s22 + $0xc8] sm:$0xff] %v1631_v31  ;;  %v2156_v6 = vadd.f32 %v2155_v34, %v2154_v33  ;;  %v2268_v30 = vadd.f32 %v2267_v36, %v2266_v27  ;;  %v2157_v37 = vpop.f32.mrb[86].mxu1  ;;  %v2269_v38 = vpop.f32.mrb[86].mxu0 }
 0x1f5   : > { %v2158_v42 = vpop.f32.mrb[87].mxu1  ;;  %v2270_v20 = vpop.f32.mrb[87].mxu0 }
 0x1f6   : > { %v1475_v51 = vadd.f32 %v2156_v6, %v3024_v39  ;;  %v2159_v43 = vadd.f32 %v2158_v42, %v2157_v37  ;;  %v2271_v46 = vadd.f32 %v2270_v20, %v2269_v38 }
 0x1f8   : > { %v1636_v24 = vadd.f32 %v2268_v30, %v1475_v51  ;;  %v1478_v47 = vadd.f32 %v2159_v43, %v3029_v45 }
 0x1fa   : > { %1684 = vst [vmem:[%s3056_s22 + $0xd0] sm:$0xff] %v1636_v24  ;;  %v1639_v48 = vadd.f32 %v2271_v46, %v1478_v47  ;;  %v2160_v50 = vpop.f32.mrb[88].mxu1  ;;  %v2272_v52 = vpop.f32.mrb[88].mxu0 }
 0x1fb   : > { %v2161_v61 = vpop.f32.mrb[89].mxu1  ;;  %v2273_v41 = vpop.f32.mrb[89].mxu0 }
 0x1fc   : > { %1685 = vst [vmem:[%s3056_s22 + $0xd8] sm:$0xff] %v1639_v48  ;;  %v2162_v53 = vadd.f32 %v2161_v61, %v2160_v50  ;;  %v2274_v13 = vadd.f32 %v2273_v41, %v2272_v52  ;;  %v2163_v21 = vpop.f32.mrb[90].mxu1  ;;  %v2275_v44 = vpop.f32.mrb[90].mxu0 }
 0x1fd   : > { %v2164_v54 = vpop.f32.mrb[91].mxu1  ;;  %v2276_v39 = vpop.f32.mrb[91].mxu0 }
 0x1fe   : > { %v1483_v57 = vadd.f32 %v2162_v53, %v3034_v60  ;;  %v2165_v49 = vadd.f32 %v2164_v54, %v2163_v21  ;;  %v2277_v59 = vadd.f32 %v2276_v39, %v2275_v44 }
 0x200   : > { %v1644_v45 = vadd.f32 %v2274_v13, %v1483_v57  ;;  %v1486_v62 = vadd.f32 %v2165_v49, %v3039_v0 }
 0x202   : > { %1686 = vst [vmem:[%s3056_s22 + $0xe0] sm:$0xff] %v1644_v45  ;;  %v1647_v22 = vadd.f32 %v2277_v59, %v1486_v62  ;;  %v2166_v1 = vpop.f32.mrb[92].mxu1  ;;  %v2278_v7 = vpop.f32.mrb[92].mxu0 }
 0x203   : > { %v2167_v28 = vpop.f32.mrb[93].mxu1  ;;  %v2279_v2 = vpop.f32.mrb[93].mxu0 }
 0x204   : > { %1687 = vst [vmem:[%s3056_s22 + $0xe8] sm:$0xff] %v1647_v22  ;;  %v2168_v3 = vadd.f32 %v2167_v28, %v2166_v1  ;;  %v2280_v55 = vadd.f32 %v2279_v2, %v2278_v7  ;;  %v2169_v56 = vpop.f32.mrb[94].mxu1  ;;  %v2281_v60 = vpop.f32.mrb[94].mxu0 }
 0x205   : > { %v2170_v4 = vpop.f32.mrb[95].mxu1  ;;  %v2282_v9 = vpop.f32.mrb[95].mxu0 }
 0x206   : > { %v1491_v0 = vadd.f32 %v2168_v3, %v3044_v15  ;;  %v2171_v58 = vadd.f32 %v2170_v4, %v2169_v56  ;;  %v2283_v10 = vadd.f32 %v2282_v9, %v2281_v60 }
 0x208   : > { %v1652_v18 = vadd.f32 %v2280_v55, %v1491_v0  ;;  %v1494_v16 = vadd.f32 %v2171_v58, %v3049_v19 }
 0x20a   : > { %1688 = vst [vmem:[%s3056_s22 + $0xf0] sm:$0xff] %v1652_v18  ;;  %v1655_v11 = vadd.f32 %v2283_v10, %v1494_v16 }
 0x20c   : > { %1689 = vst [vmem:[%s3056_s22 + $0xf8] sm:$0xff] %v1655_v11 }
 0x20d   : > { %2629 = shalt.err (!%p2626_p7)
}
 0x20e   : > { %s2630_s25 = scalar_lea.hbm %s3137_s27, 4096  ;;  %s2634_s9 = scalar_lea.hbm %s3188_s3, 8192 }
 0x20f   : > { %p2631_p9 = scmp.ne.s32.totalorder %s3137_s27, %s2630_s25  ;;  %p2635_p5 = scmp.lt.u32.totalorder %s3137_s27, %s3188_s3 }
 0x210   : > { %p2636_p11 = scmp.lt.u32.totalorder %s2634_s9, %s2630_s25  ;;  %p2638_p4 = scmp.lt.u32.totalorder %s2630_s25, %s3137_s27 }
 0x211   : > { %p2632_p2 = pnand %p2631_p9, %p2808_p12 }
 0x212   : > { %p2637_p1 = por %p2636_p11, %p2635_p5 }
 0x213   : > { %p2633_p0 = pneg %p2632_p2 }
 0x214   : > { %p2639_p6 = por %p2638_p4, %p2637_p1 }
 0x216   : > { %p2640_p8 = pnand %p2639_p6, %p2633_p0 }
 0x218   : > { %2643 = shalt.err (!%p2640_p8)
}
 0x219   : > { %s2695_s4 = smov 128   ;;  %s2696_s22 = smov 8  }
 0x21a   : > { %2309 = dma.vmem_to_hbm [thread:$0]  (%p2808_p12), %s3139_s5, 4096, %s3137_s27, %s1691_s28, %s2695_s4, %s2695_s4, %s2696_s22  }
 0x21b PF: > { %s1719_s26 = sand.u32 1, %s2674_s12   ;;  %p3203_p10 = scmp.ne.s32.totalorder %s3193_s19, 0 }
 0x21c   : > { %p3204_p13 = scmp.ge.s32.totalorder %s2686_s15, 2  ;;  %s1720_s10 = scalar_lea.sflag [#allocation4], %s1719_s26 }
 0x21e   : > { %p2320_p3 = pnand %p3204_p13, %p3203_p10 }
 0x220   : > { %2669 = dma.done.wait (!%p2320_p3), %s1720_s10, 4096  }
 0x221   : > { %2671 = vsyncadd (!%p2320_p3), %s1720_s10, 4294963200  ;;  %p17_p7 = scmp.ge.s32.totalorder %s2773_s24, 4   ;;  %s3205_s12 = smov %s2678_s13 }
 0x222   : > { %s3206_s13 = smov %s2682_s14  ;;  %s3207_s14 = smov %s2804_s17 }
 0x223   : > { %s3208_s15 = smov %s2773_s24  ;;  %19 = sbr.rel (!%p17_p7) target bundleno = 6 (0x6), region = 81 }
 0x22a   :  { %1725 = vsyncpa [#allocation3], 1 }
 0x22b   :  { %1727 = vsyncpa [#allocation3 + $0x1], 1 }
 0x22c   :  { %1728 = vsyncpa [#allocation6], 1 }
 0x22d   :  { %1729 = vsyncpa [#allocation4], 1 }
 0x22e   :  { %1731 = vsyncpa [#allocation4 + $0x1], 1 }

</bundles_post_ra>
